<compile_context>
chip_gen: v6e
topology: v6e:2x2x1
jax: 0.10.0
libtpu: 0.0.40
codegen_flags: <defaults>
</compile_context>

<pallas_src>
import jax
import jax.numpy as jnp
from jax.experimental import pallas as pl
from jax.experimental.pallas import tpu as pltpu


def _round_up(n: int, m: int) -> int:
    return ((n + m - 1) // m) * m


def _make_critic_kernel(n_enc_layers: int):
    """Kernel body for one batch tile: n_enc_layers x (Linear+ReLU), then Linear->1."""

    def kernel(*refs):
        # refs = [x, w1, b1, ..., wN, bN, wf8, out]
        x_ref = refs[0]
        out_ref = refs[-1]
        params = refs[1:-1]

        x = x_ref[...]                       # (TB, in_dim), f32 or bf16
        idx = 0
        for _ in range(n_enc_layers):
            w = params[idx][...]             # (in, hidden), f32 or bf16
            b = params[idx + 1][...]         # (1, hidden), f32
            idx += 2
            # MXU matmul with f32 accumulation; bias add + ReLU stay f32 on the VPU.
            # astype is a no-op on the first layer (x already in w.dtype).
            h = jnp.dot(x.astype(w.dtype), w, preferred_element_type=jnp.float32)
            x = jnp.maximum(h + b, 0.0)      # nn.ReLU

        wf8 = params[idx][...]               # (8, in): row 0 = final weight, rows 1..7 zero
        # Final Linear(in -> 1): contract both operands on their last dim.
        # Same rhs-transposed MXU pattern as flash-attention's q @ k^T (no XLU
        # transpose of the big activation tile); result (8, TB), keep row 0 so
        # the store is a lane-dense (1, TB) row slab.
        y8 = jax.lax.dot_general(
            wf8, x.astype(wf8.dtype),
            dimension_numbers=(((1,), (1,)), ((), ())),
            preferred_element_type=jnp.float32)          # (8, TB)
        out_ref[...] = y8[0:1, :]                        # (1, TB), lane-dense store

    return kernel


def gapn_critic_forward(x, enc_weights, enc_biases, final_w, final_b, *,
                        tile_b: int = 8192, use_bf16_matmul: bool = False):
    """GAPN_Critic MLP head in a single batch-tiled Pallas kernel.

    Args:
      x:           (B, in_dim) float32 graph embeddings.
      enc_weights: list of (in, hidden) float32 weights (already transposed).
      enc_biases:  list of (1, hidden) float32 biases.
      final_w:     (hidden_or_in, 1) float32.
      final_b:     (1, 1) float32.
      tile_b:      max batch rows per grid step (rounded to a multiple of 128).
                   Default 8192 (1 MiB f32 x-tile); on v7x 16384-32768 is also
                   comfortably within VMEM.
      use_bf16_matmul: cast x and matmul weights to bf16 (f32 accumulate) —
        halves the dominant x DMA and hits the native bf16 MXU path; keep
        False for exact f32 module semantics.
    Returns:
      (B,) float32 values (== final_layer(X).squeeze(1)).
    """
    n_enc = len(enc_weights)
    B, in_dim = x.shape

    mm_dtype = jnp.bfloat16 if use_bf16_matmul else jnp.float32
    # Cast once in the wrapper so the x-tile DMA itself is half-width on the
    # bf16 path (x reads dominate HBM traffic for this kernel).
    x = x.astype(mm_dtype)

    # Tile selection: no wrapper-side padding of B. Small batches use one
    # full-array block (no alignment constraint); larger batches use >=2
    # lane-aligned (multiple-of-128) tiles so a v7x megacore can place one on
    # each TensorCore, capped at tile_b. The last block may be ragged; Pallas
    # masks the edge DMA and the wrapper slices [:B].
    tile_b = max(128, _round_up(int(tile_b), 128))
    if B <= 128:
        tb = B
    elif B <= 2 * tile_b:
        tb = _round_up(pl.cdiv(B, 2), 128)
    else:
        tb = tile_b
    grid = (pl.cdiv(B, tb),)

    operands = [x]
    in_specs = [pl.BlockSpec((tb, in_dim), lambda i: (i, 0))]
    for w, b in zip(enc_weights, enc_biases):
        w = jnp.asarray(w, mm_dtype)
        b = jnp.asarray(b, jnp.float32).reshape(1, -1)
        operands += [w, b]
        # Parameters: full-array blocks with a constant block index -> fetched
        # once and kept VMEM-resident across all grid steps.
        in_specs += [pl.BlockSpec(w.shape, lambda i: (0, 0)),
                     pl.BlockSpec(b.shape, lambda i: (0, 0))]
    # Final-layer weight as an (8, in) slab: row 0 is the real weight row,
    # rows 1..7 are zeros so the MXU operand is sublane-aligned.
    wf_row = jnp.asarray(final_w, mm_dtype).reshape(1, -1)
    wf8 = jnp.concatenate(
        [wf_row, jnp.zeros((7, wf_row.shape[1]), mm_dtype)], axis=0)
    operands += [wf8]
    in_specs += [pl.BlockSpec(wf8.shape, lambda i: (0, 0))]

    out = pl.pallas_call(
        _make_critic_kernel(n_enc),
        out_shape=jax.ShapeDtypeStruct((1, B), jnp.float32),
        grid=grid,
        in_specs=in_specs,
        # Lane-dense output: each grid step writes a (1, TB) row slab (the
        # last one masked to the valid lanes).
        out_specs=pl.BlockSpec((1, tb), lambda i: (0, i)),
        compiler_params=pltpu.CompilerParams(
            dimension_semantics=("parallel",)),
    )(*operands)

    # Final bias added outside the kernel (one tiny XLA op over (B,)).
    return out[0, :] + jnp.asarray(final_b, jnp.float32).reshape(())


def _linear_init(key, fan_in, fan_out):
    """Deterministic init mimicking torch.nn.Linear default U(-1/sqrt(in), 1/sqrt(in))."""
    kw, kb = jax.random.split(key)
    bound = 1.0 / jnp.sqrt(float(fan_in))
    w = jax.random.uniform(kw, (fan_in, fan_out), jnp.float32, -bound, bound)
    b = jax.random.uniform(kb, (1, fan_out), jnp.float32, -bound, bound)
    return w, b


def _reference_forward(x, enc_weights, enc_biases, final_w, final_b):
    h = x
    for w, b in zip(enc_weights, enc_biases):
        h = jnp.maximum(h @ w + b, 0.0)
    return (h @ final_w + final_b)[:, 0]


if __name__ == "__main__":
    # Shapes consistent with the module:
    #   gnn_nb_layers = 0  -> in_dim = input_dim
    #   enc_nb_layers = 2, enc_nb_hidden = 32
    batch = 8
    input_dim = 32
    enc_nb_layers = 2
    enc_nb_hidden = 32

    key = jax.random.PRNGKey(0)
    kx, kbig, *pkeys = jax.random.split(key, 3 + enc_nb_layers)

    # g_emb: already-embedded graph representations (B, input_dim)
    g_emb = jax.random.normal(kx, (batch, input_dim), jnp.float32)

    enc_weights, enc_biases = [], []
    in_dim = input_dim
    for li in range(enc_nb_layers):
        w, b = _linear_init(pkeys[li], in_dim, enc_nb_hidden)
        enc_weights.append(w)
        enc_biases.append(b)
        in_dim = enc_nb_hidden
    final_w, final_b = _linear_init(pkeys[-1], in_dim, 1)

    ref = _reference_forward(g_emb, enc_weights, enc_biases, final_w, final_b)

    # --- f32 path, small batch (single full-array block) ---
    values = gapn_critic_forward(g_emb, enc_weights, enc_biases, final_w, final_b)
    values = jax.block_until_ready(values)
    assert values.shape == (batch,), values.shape
    assert jnp.allclose(values, ref, atol=1e-5, rtol=1e-5), (values, ref)

    # --- bf16 MXU operands (x DMA'd as bf16), f32 accumulate ---
    values_bf16 = gapn_critic_forward(g_emb, enc_weights, enc_biases, final_w,
                                      final_b, use_bf16_matmul=True)
    values_bf16 = jax.block_until_ready(values_bf16)
    assert jnp.allclose(values_bf16, ref, atol=5e-2, rtol=5e-2), (values_bf16, ref)

    # --- larger batch, no wrapper padding: 2-tile grid with a ragged last block ---
    big_b = 1037  # -> tb = 640, grid = 2 (640 + 397 rows)
    g_emb_big = jax.random.normal(kbig, (big_b, input_dim), jnp.float32)
    values_big = gapn_critic_forward(g_emb_big, enc_weights, enc_biases,
                                     final_w, final_b)
    values_big = jax.block_until_ready(values_big)
    ref_big = _reference_forward(g_emb_big, enc_weights, enc_biases,
                                 final_w, final_b)
    assert values_big.shape == (big_b,), values_big.shape
    assert jnp.allclose(values_big, ref_big, atol=1e-4, rtol=1e-4), "big-batch mismatch"

    # --- many-tile grid (forced small tile) to exercise the pipelined loop ---
    values_many = gapn_critic_forward(g_emb_big, enc_weights, enc_biases,
                                      final_w, final_b, tile_b=256)
    values_many = jax.block_until_ready(values_many)
    assert jnp.allclose(values_many, ref_big, atol=1e-4, rtol=1e-4), "many-tile mismatch"

    print("KERNEL_OK")
</pallas_src>

<mosaic_0001>
module attributes {stable_mosaic.version = 11 : i64} {
  func.func @kernel(%arg0: i32, %arg1: memref<8x32xf32, #tpu.memory_space<vmem>>, %arg2: memref<32x32xf32, #tpu.memory_space<vmem>>, %arg3: memref<1x32xf32, #tpu.memory_space<vmem>>, %arg4: memref<32x32xf32, #tpu.memory_space<vmem>>, %arg5: memref<1x32xf32, #tpu.memory_space<vmem>>, %arg6: memref<8x32xf32, #tpu.memory_space<vmem>>, %arg7: memref<1x8xf32, #tpu.memory_space<vmem>>) attributes {dimension_semantics = [#tpu.dimension_semantics<parallel>], iteration_bounds = array<i64: 1>, scalar_prefetch = 0 : i64, scratch_operands = 0 : i64, tpu.core_type = #tpu.core_type<tc>, window_params = [{transform_indices = @transform_0, window_bounds = array<i64: 8, 32>}, {pipeline_mode = #tpu.pipeline_mode<synchronous>, transform_indices = @transform_1, window_bounds = array<i64: 32, 32>}, {pipeline_mode = #tpu.pipeline_mode<synchronous>, transform_indices = @transform_2, window_bounds = array<i64: 1, 32>}, {pipeline_mode = #tpu.pipeline_mode<synchronous>, transform_indices = @transform_3, window_bounds = array<i64: 32, 32>}, {pipeline_mode = #tpu.pipeline_mode<synchronous>, transform_indices = @transform_4, window_bounds = array<i64: 1, 32>}, {pipeline_mode = #tpu.pipeline_mode<synchronous>, transform_indices = @transform_5, window_bounds = array<i64: 8, 32>}, {transform_indices = @transform_6, window_bounds = array<i64: 1, 8>}]} {
    %c0 = arith.constant 0 : index
    %c0_0 = arith.constant 0 : index
    %0 = vector.load %arg1[%c0, %c0_0] : memref<8x32xf32, #tpu.memory_space<vmem>>, vector<8x32xf32>
    %c0_1 = arith.constant 0 : index
    %c0_2 = arith.constant 0 : index
    %1 = vector.load %arg2[%c0_1, %c0_2] : memref<32x32xf32, #tpu.memory_space<vmem>>, vector<32x32xf32>
    %c0_3 = arith.constant 0 : index
    %c0_4 = arith.constant 0 : index
    %2 = vector.load %arg3[%c0_3, %c0_4] : memref<1x32xf32, #tpu.memory_space<vmem>>, vector<1x32xf32>
    %cst = arith.constant dense<0.000000e+00> : vector<8x32xf32>
    %3 = tpu.matmul %0, %1, %cst {dimension_numbers = #tpu.dot_dimension_numbers<[1], [0], [0], [1], [0, 0, 1, 1], [], []>} : vector<8x32xf32>, vector<32x32xf32>, vector<8x32xf32> -> vector<8x32xf32>
    %4 = vector.broadcast %2 : vector<1x32xf32> to vector<8x32xf32>
    %5 = arith.addf %3, %4 : vector<8x32xf32>
    %cst_5 = arith.constant 0.000000e+00 : f32
    %6 = vector.broadcast %cst_5 : f32 to vector<8x32xf32>
    %7 = arith.maximumf %5, %6 : vector<8x32xf32>
    %c0_6 = arith.constant 0 : index
    %c0_7 = arith.constant 0 : index
    %8 = vector.load %arg4[%c0_6, %c0_7] : memref<32x32xf32, #tpu.memory_space<vmem>>, vector<32x32xf32>
    %c0_8 = arith.constant 0 : index
    %c0_9 = arith.constant 0 : index
    %9 = vector.load %arg5[%c0_8, %c0_9] : memref<1x32xf32, #tpu.memory_space<vmem>>, vector<1x32xf32>
    %cst_10 = arith.constant dense<0.000000e+00> : vector<8x32xf32>
    %10 = tpu.matmul %7, %8, %cst_10 {dimension_numbers = #tpu.dot_dimension_numbers<[1], [0], [0], [1], [0, 0, 1, 1], [], []>} : vector<8x32xf32>, vector<32x32xf32>, vector<8x32xf32> -> vector<8x32xf32>
    %11 = vector.broadcast %9 : vector<1x32xf32> to vector<8x32xf32>
    %12 = arith.addf %10, %11 : vector<8x32xf32>
    %cst_11 = arith.constant 0.000000e+00 : f32
    %13 = vector.broadcast %cst_11 : f32 to vector<8x32xf32>
    %14 = arith.maximumf %12, %13 : vector<8x32xf32>
    %c0_12 = arith.constant 0 : index
    %c0_13 = arith.constant 0 : index
    %15 = vector.load %arg6[%c0_12, %c0_13] : memref<8x32xf32, #tpu.memory_space<vmem>>, vector<8x32xf32>
    %cst_14 = arith.constant dense<0.000000e+00> : vector<8x8xf32>
    %16 = tpu.matmul %15, %14, %cst_14 {dimension_numbers = #tpu.dot_dimension_numbers<[1], [1], [0], [0], [0, 0, 1, 0], [], []>} : vector<8x32xf32>, vector<8x32xf32>, vector<8x8xf32> -> vector<8x8xf32>
    %17 = vector.extract_strided_slice %16 {offsets = [0, 0], sizes = [1, 8], strides = [1, 1]} : vector<8x8xf32> to vector<1x8xf32>
    %c0_15 = arith.constant 0 : index
    %c0_16 = arith.constant 0 : index
    %18 = vector.load %arg7[%c0_15, %c0_16] : memref<1x8xf32, #tpu.memory_space<vmem>>, vector<1x8xf32>
    tpu.vector_store %arg7[%c0_15, %c0_16], %17 {strides = array<i32>} : memref<1x8xf32, #tpu.memory_space<vmem>>, vector<1x8xf32>,
    return
  }
  func.func @transform_0(%arg0: i32) -> (i32, i32) {
    %c0_i32 = arith.constant 0 : i32
    %c0_i32_0 = arith.constant 0 : i32
    return %arg0, %c0_i32 : i32, i32
  }
  func.func @transform_1(%arg0: i32) -> (i32, i32) {
    %c0_i32 = arith.constant 0 : i32
    %c0_i32_0 = arith.constant 0 : i32
    %c0_i32_1 = arith.constant 0 : i32
    return %c0_i32, %c0_i32_0 : i32, i32
  }
  func.func @transform_2(%arg0: i32) -> (i32, i32) {
    %c0_i32 = arith.constant 0 : i32
    %c0_i32_0 = arith.constant 0 : i32
    %c0_i32_1 = arith.constant 0 : i32
    return %c0_i32, %c0_i32_0 : i32, i32
  }
  func.func @transform_3(%arg0: i32) -> (i32, i32) {
    %c0_i32 = arith.constant 0 : i32
    %c0_i32_0 = arith.constant 0 : i32
    %c0_i32_1 = arith.constant 0 : i32
    return %c0_i32, %c0_i32_0 : i32, i32
  }
  func.func @transform_4(%arg0: i32) -> (i32, i32) {
    %c0_i32 = arith.constant 0 : i32
    %c0_i32_0 = arith.constant 0 : i32
    %c0_i32_1 = arith.constant 0 : i32
    return %c0_i32, %c0_i32_0 : i32, i32
  }
  func.func @transform_5(%arg0: i32) -> (i32, i32) {
    %c0_i32 = arith.constant 0 : i32
    %c0_i32_0 = arith.constant 0 : i32
    %c0_i32_1 = arith.constant 0 : i32
    return %c0_i32, %c0_i32_0 : i32, i32
  }
  func.func @transform_6(%arg0: i32) -> (i32, i32) {
    %c0_i32 = arith.constant 0 : i32
    %c0_i32_0 = arith.constant 0 : i32
    return %c0_i32, %arg0 : i32, i32
  }
}

</mosaic_0001>

<bundles_post_ra>
// kernel: tpu_custom_call.1
= control target key start
LH: loop header
LB: loop body
LE: loop exit
PB: predicated region body
PF: predicated region fallthrough
CT: control target
= control target key end

     0   :  { %11 = vsyncpa [#allocation3], 0  ;;  %s577_s0 = inlined_call_operand.hbm [shape: f32[8,32], index: 0, kind: input, shape index: {}]   ;;  %s578_s1 = inlined_call_operand.hbm [shape: f32[32,32], index: 1, kind: input, shape index: {}]   ;;  %s579_s2 = inlined_call_operand.vmem [shape: f32[1,32], index: 2, kind: input, shape index: {}]   ;;  %s580_s3 = inlined_call_operand.hbm [shape: f32[32,32], index: 3, kind: input, shape index: {}]   ;;  %s581_s4 = inlined_call_operand.hbm [shape: f32[1,32], index: 4, kind: input, shape index: {}]   ;;  %s582_s5 = inlined_call_operand.vmem [shape: f32[8,32], index: 5, kind: input, shape index: {}]   ;;  %s583_s6 = inlined_call_operand.hbm [shape: f32[1,8], index: 6, kind: output, shape index: {}]  }
   0x1   :  { %12 = vsyncpa [#allocation6], 0 }
   0x2   :  { %13 = vsyncpa [#allocation9], 0 }
   0x3   :  { %14 = vsyncpa [#allocation4], 0  ;;  %s505_s21 = smov [#allocation5]  }
   0x4   :  { %s30_s22 = sshll.u32 %s505_s21, 4  ;;  %s31_s22 = int_to_ptr.vmem [resolvable:$true] %s30_s22 }
   0x5   :  { %s405_s23 = scalar_lea.vmem %s31_s22, 512  ;;  %p410_p1 = scmp.lt.s32.totalorder %s31_s22, %s31_s22 }
   0x6   :  { %p406_p0 = scmp.ne.s32.totalorder %s31_s22, %s405_s23  ;;  %p411_p2 = scmp.lt.s32.totalorder %s405_s23, %s405_s23 }
   0x8   :  { %p412_p3 = por %p411_p2, %p410_p1 }
   0xa   :  { %p413_p4 = pnand %p412_p3, %p406_p0 }
   0xc   :  { %416 = shalt.err (!%p413_p4)
}
   0xd   :  { %s506_s24 = smov 128   ;;  %s507_s25 = smov 8  }
   0xe   :  { %36 = dma.hbm_to_vmem [thread:$0]  %s578_s1, 512, %s31_s22, [#allocation6], %s506_s24, %s506_s24, %s507_s25  }
   0xf   :  { %s508_s28 = smov [#allocation2]   ;;  %s509_s30 = smov [#allocation7]  }
  0x10   :  { %s21_s29 = sshll.u32 %s508_s28, 4  ;;  %s44_s7 = sshll.u32 %s509_s30, 4  ;;  %s22_s29 = int_to_ptr.vmem [resolvable:$true] %s21_s29  ;;  %s45_s7 = int_to_ptr.vmem [resolvable:$true] %s44_s7 }
  0x11   :  { %s425_s8 = scalar_lea.vmem %s22_s29, 128  ;;  %p430_p6 = scmp.lt.s32.totalorder %s22_s29, %s22_s29 }
  0x12   :  { %p426_p5 = scmp.ne.s32.totalorder %s22_s29, %s425_s8  ;;  %p431_p7 = scmp.lt.s32.totalorder %s425_s8, %s425_s8 }
  0x14   :  { %p432_p8 = por %p431_p7, %p430_p6 }
  0x16   :  { %p433_p9 = pnand %p432_p8, %p426_p5 }
  0x18   :  { %436 = shalt.err (!%p433_p9)
}
  0x19   :  { %24 = dma.hbm_to_vmem [thread:$0]  %s577_s0, 128, %s22_s29, [#allocation3]  }
  0x1a   :  { %s445_s11 = scalar_lea.vmem %s45_s7, 512  ;;  %p450_p11 = scmp.lt.s32.totalorder %s45_s7, %s45_s7 }
  0x1b   :  { %p446_p10 = scmp.ne.s32.totalorder %s45_s7, %s445_s11  ;;  %p451_p12 = scmp.lt.s32.totalorder %s445_s11, %s445_s11 }
  0x1d   :  { %p452_p13 = por %p451_p12, %p450_p11 }
  0x1f   :  { %p453_p0 = pnand %p452_p13, %p446_p10 }
  0x21   :  { %456 = shalt.err (!%p453_p0)
}
  0x22   :  { %50 = dma.hbm_to_vmem [thread:$0]  %s580_s3, 512, %s45_s7, [#allocation6], %s506_s24, %s506_s24, %s507_s25  }
  0x23   :  { %s510_s13 = smov [#allocation8]  }
  0x24   :  { %s57_s14 = sshll.u32 %s510_s13, 4  ;;  %s58_s14 = int_to_ptr.vmem [resolvable:$true] %s57_s14 }
  0x25   :  { %s465_s15 = scalar_lea.vmem %s58_s14, 16  ;;  %s469_s16 = scalar_lea.vmem %s58_s14, 32 }
  0x26   :  { %p466_p1 = scmp.ne.s32.totalorder %s58_s14, %s465_s15  ;;  %p470_p2 = scmp.lt.s32.totalorder %s58_s14, %s58_s14 }
  0x27   :  { %p471_p3 = scmp.lt.s32.totalorder %s469_s16, %s465_s15 }
  0x29   :  { %p472_p4 = por %p471_p3, %p470_p2 }
  0x2b   :  { %p473_p5 = pnand %p472_p4, %p466_p1 }
  0x2d   :  { %476 = shalt.err (!%p473_p5)
}
  0x2e   :  { %60 = dma.hbm_to_vmem [thread:$0]  %s581_s4, 16, %s58_s14, [#allocation9]  }
  0x2f   :  { %497 = dma.done.wait [#allocation3], 128  }
  0x30   :  { %498 = vsyncadd [#allocation3], 4294967168 }
  0x31   :  { %499 = dma.done.wait [#allocation6], 1024  }
  0x32   :  { %500 = vsyncadd [#allocation6], 4294966272 }
  0x33   :  { %501 = dma.done.wait [#allocation9], 16  }
  0x34   :  { %502 = vsyncadd [#allocation9], 4294967280  ;;  %v511_v0 = vmov 0.0   ;;  %vm512_vm0 = vmmov 0   ;;  %v79_v1 = vld [vmem:[#allocation5 + $0x18] sm:$0xff]  ;;  %v78_v2 = vld [vmem:[#allocation5 + $0x10] sm:$0xff] }
  0x35   :  { %361 = vmatprep.subr.mxu0 %v511_v0  ;;  %369 = vmatprep.mubr.msk.f32.mxu0 %vm512_vm0, %v511_v0  ;;  %v165_v3 = vld [vmem:[#allocation7 + $0x18] sm:$0xff]  ;;  %v77_v4 = vld [vmem:[#allocation5 + $0x8] sm:$0xff]  ;;  %v76_v5 = vld [vmem:[#allocation5] sm:$0xff]  ;;  %vm87_vm1 = vcmask 261120   ;;  %vm324_vm2 = vcmask 57344  }
  0x36   :  { %372 = vmatprep.subr.mxu1 %v511_v0  ;;  %380 = vmatprep.mubr.msk.f32.mxu1 %vm512_vm0, %v511_v0  ;;  %v75_v6 = vld [vmem:[#allocation2] sm:$0xff]  ;;  %v164_v7 = vld [vmem:[#allocation7 + $0x10] sm:$0xff]  ;;  %v163_v8 = vld [vmem:[#allocation7 + $0x8] sm:$0xff] }
  0x37   :  { %362 = vmatpush3.msra.mxu0 %v79_v1  ;;  %373 = vmatpush3.msra.mxu1 %v165_v3  ;;  %v162_v9 = vld [vmem:[#allocation7] sm:$0xff]  ;;  %v343_v10 = vld [vmem:[%s579_s2] ss:$0 sm:$0xff]  ;;  %s513_s2 = smov [#allocation10]  }
  0x38   :  { %363 = vmatprep.subr.mxu0 %v511_v0  ;;  %374 = vmatprep.subr.mxu1 %v511_v0  ;;  %v345_v15 = vld [vmem:[#allocation8] ss:$0 sm:$0xff]  ;;  %v247_v20 = vld [vmem:[%s582_s5] sm:$0xff]  ;;  %s332_s20 = sshll.u32 %s513_s2, 4  ;;  %s333_s20 = int_to_ptr.vmem [resolvable:$true] %s332_s20 }
  0x39   :  { %364 = vmatpush3.msra.mxu0 %v78_v2  ;;  %375 = vmatpush3.msra.mxu1 %v164_v7  ;;  %s477_s21 = scalar_lea.vmem %s333_s20, 16  ;;  %s481_s22 = scalar_lea.vmem %s333_s20, 32 }
  0x3a   :  { %365 = vmatprep.subr.mxu0 %v511_v0  ;;  %376 = vmatprep.subr.mxu1 %v511_v0  ;;  %p478_p6 = scmp.ne.s32.totalorder %s333_s20, %s477_s21  ;;  %p482_p7 = scmp.lt.s32.totalorder %s333_s20, %s333_s20 }
  0x3b   :  { %366 = vmatpush3.msra.mxu0 %v77_v4  ;;  %377 = vmatpush3.msra.mxu1 %v163_v8  ;;  %p483_p8 = scmp.lt.s32.totalorder %s481_s22, %s477_s21 }
  0x3c   :  { %367 = vmatprep.subr.mxu0 %v511_v0  ;;  %378 = vmatprep.subr.mxu1 %v511_v0 }
  0x3d   :  { %368 = vmatpush3.msra.mxu0 %v76_v5  ;;  %379 = vmatpush3.msra.mxu1 %v162_v9  ;;  %p484_p9 = por %p483_p8, %p482_p7 }
  0x3e   :  { %370 = vmatmul.mubr.msk.f32.vlgmr.msra.gmra.mxu0 %vm87_vm1, %v75_v6  ;;  %383 = vmatprep.subr.mxu0 %v511_v0 }
  0x3f   :  { %385 = vmatprep.mubr.msk.f32.mxu0 %vm512_vm0, %v511_v0  ;;  %p485_p10 = pnand %p484_p9, %p478_p6 }
  0xfe   :  { %v157_v11 = vpop.f32.mrf.mxu0 }
  0xff   :  { %v158_v12 = vadd.f32 %v343_v10, %v157_v11 }
 0x100   :  { %v371_v13 = vpop.f32.mrf.mxu0 }
 0x101   :  { %v161_v14 = vmax.f32 %v158_v12, 0.0 }
 0x103   :  { %381 = vmatmul.mubr.msk.f32.vlgmr.msra.gmra.mxu1 %vm87_vm1, %v161_v14 }
 0x1c3   :  { %v242_v16 = vpop.f32.mrf.mxu1 }
 0x1c4   :  { %v243_v17 = vadd.f32 %v345_v15, %v242_v16 }
 0x1c5   :  { %v382_v18 = vpop.f32.mrf.mxu1 }
 0x1c6   :  { %v246_v19 = vmax.f32 %v243_v17, 0.0 }
 0x1c8   :  { %384 = vmatpush3.xpose.msk.msra.mxu0 %vm87_vm1, %v246_v19 }
 0x1cb   :  { %386 = vmatmul.mubr.msk.f32.vlgmr.msra.gmra.mxu0 %vm87_vm1, %v247_v20 }
 0x28b   :  { %v320_v21 = vpop.f32.mrf.mxu0 }
 0x28c   :  { %325 = vst.msk [vmem:[#allocation10] sm:$0x1] %vm324_vm2, %v320_v21 }
 0x28d   :  { %v387_v22 = vpop.f32.mrf.mxu0 }
 0x28e   :  { %488 = shalt.err (!%p485_p10)
}
 0x28f   :  { %335 = dma.vmem_to_hbm [thread:$0]  %s333_s20, 16, %s583_s6, [#allocation4]  }
 0x290   :  { %503 = dma.done.wait [#allocation4], 16  }
 0x291   :  { %504 = vsyncadd [#allocation4], 4294967280 }
 0x292   :  { %339 = vsyncpa [#allocation3], 1 }
 0x293   :  { %340 = vsyncpa [#allocation6], 1 }
 0x294   :  { %341 = vsyncpa [#allocation9], 1 }
 0x295   :  { %342 = vsyncpa [#allocation4], 1 }

</bundles_post_ra>
